<compile_context>
chip_gen: v7x
topology: tpu7x:2x2x1
jax: 0.10.0
libtpu: 0.0.40
codegen_flags: <defaults>
</compile_context>

<pallas_src>
import jax
import jax.numpy as jnp
from jax.experimental import pallas as pl
from jax.experimental.pallas import tpu as pltpu

# ----------------------- problem configuration (static) ----------------------
B = 2             # batch
L = 16            # sequence length (temporal dim)
IN_SIZE = 8       # in_size == out_size == hidden so residual skips are valid
OUT_SIZE = 8
HIDDEN_SIZES = [8]                       # features = [8, 8, 8] -> 2 conv layers
K = 3                                    # kernel_size
FEATURES = [IN_SIZE] + HIDDEN_SIZES + [OUT_SIZE]
NUM_LAYERS = len(FEATURES) - 1
C = IN_SIZE                              # all channel widths equal
PAD_LEFT = (K - 1) // 2                  # PyTorch 'same': left gets total // 2
PAD_RIGHT = (K - 1) - PAD_LEFT
BL = B * L

# Packed-parameter column layout (single (C, PCOLS) f32 buffer):
#   [0, NUM_LAYERS*K*C)           per-layer conv weights, each (C_out, K*C_in)
#   [DW_OFF, DW_OFF + C)          dense weight transposed, (C_out, C_in)
#   [CB_OFF + layer]              conv bias column for `layer`, (C, 1)
#   [DB_OFF]                      dense bias column, (C, 1)
DW_OFF = NUM_LAYERS * K * C              # 48
CB_OFF = DW_OFF + C                      # 56
DB_OFF = CB_OFF + NUM_LAYERS             # 58
PCOLS = DB_OFF + 1                       # 59


# --------------------------------- kernel ------------------------------------
def tcn_kernel(x_ref, p_ref, o_ref):
    """Whole problem in one invocation, time-on-lanes layout.

    x_ref : (C, B*L)      activations; column j = (batch j//L, time j%L)
    p_ref : (C, PCOLS)    packed parameters (see column layout above)
    o_ref : (C, B*L)      output (aliased with x_ref's buffer)
    """
    cur = x_ref[...].astype(jnp.float32)        # register-resident activations

    # Temporal position of every column inside its own sequence; used to mask
    # the +/-1 lane shifts at batch boundaries.  Built once, reused by layers.
    pos = jax.lax.broadcasted_iota(jnp.int32, (C, BL), 1) % L
    has_prev = pos > 0          # col has a valid predecessor l-1 in its sequence
    has_next = pos < (L - 1)    # col has a valid successor l+1 in its sequence

    for layer in range(NUM_LAYERS):             # statically unrolled (2 layers)
        # Shifted views via single-vreg lane rotations + boundary masks
        # ('same' zero padding at sequence edges).
        x_prev = jnp.where(has_prev, pltpu.roll(cur, 1, axis=1), 0.0)       # x[l-1]
        x_next = jnp.where(has_next, pltpu.roll(cur, BL - 1, axis=1), 0.0)  # x[l+1]

        # Sublane-stack the K taps (free vreg placement) -> one MXU matmul.
        xk = jnp.concatenate([x_prev, cur, x_next], axis=0)     # (K*C, B*L)
        w = p_ref[:, layer * K * C:(layer + 1) * K * C]         # (C, K*C)
        b = p_ref[:, CB_OFF + layer:CB_OFF + layer + 1]         # (C, 1)
        acc = jnp.dot(w, xk, preferred_element_type=jnp.float32) + b

        # dropout(p=0) = identity; activation (ReLU); residual skip.
        cur = jnp.maximum(acc, 0.0) + cur

    # Final dense layer (DenseNetwork modeled as a single Linear).
    dw = p_ref[:, DW_OFF:DW_OFF + C]                            # (C_out, C_in)
    db = p_ref[:, DB_OFF:DB_OFF + 1]                            # (C, 1)
    out = jnp.dot(dw, cur, preferred_element_type=jnp.float32) + db
    o_ref[...] = out.astype(o_ref.dtype)                        # lane-dense store


# --------------------- one-time parameter packing (init) ---------------------
def pack_params(conv_w, conv_b, dense_w, dense_b):
    """Pack all parameters into one (C, PCOLS) f32 buffer. Called once at init.

    conv_w : (NUM_LAYERS, K, C_in, C_out)
    conv_b : (NUM_LAYERS, 1, C)
    dense_w: (C_in, C_out)
    dense_b: (1, C)
    """
    cols = []
    for layer in range(NUM_LAYERS):
        # (K, C_in, C_out) -> (K*C_in, C_out) -> (C_out, K*C_in)
        cols.append(conv_w[layer].reshape(K * C, C).T)
    cols.append(dense_w.T)                                      # (C_out, C_in)
    for layer in range(NUM_LAYERS):
        cols.append(conv_b[layer].reshape(C, 1))                # (C, 1)
    cols.append(dense_b.reshape(C, 1))                          # (C, 1)
    packed = jnp.concatenate(cols, axis=1).astype(jnp.float32)  # (C, PCOLS)
    assert packed.shape == (C, PCOLS)
    return packed


# -------------------------------- wrapper ------------------------------------
_COST = pl.CostEstimate(
    flops=2 * (NUM_LAYERS * BL * (K * C) * C + BL * C * C),     # ~28.7 KFLOP
    transcendentals=0,
    bytes_accessed=(2 * BL * C + PCOLS * C) * 4,
)


@jax.jit
def tcn_forward(x, packed_params):
    # x: (B, L, C) -> time-on-lanes (C, B*L); tiny relayout, done in-jit.
    xT = x.reshape(BL, C).T

    vmem = pl.BlockSpec(memory_space=pltpu.MemorySpace.VMEM)
    outT = pl.pallas_call(
        tcn_kernel,
        out_shape=jax.ShapeDtypeStruct((C, BL), x.dtype),
        in_specs=[vmem, vmem],
        out_specs=vmem,
        input_output_aliases={0: 0},        # reuse xT's buffer for the output
        cost_estimate=_COST,
    )(xT, packed_params)
    return outT.T.reshape(B, L, C)


# ------------------------ pure-JAX reference (for check) ---------------------
def tcn_reference(x, conv_w, conv_b, dense_w, dense_b):
    cur = x
    for layer in range(NUM_LAYERS):
        xp = jnp.pad(cur, ((0, 0), (PAD_LEFT, PAD_RIGHT), (0, 0)))
        acc = jnp.zeros_like(cur)
        for k in range(K):
            acc = acc + jnp.einsum("blc,cd->bld", xp[:, k:k + L, :], conv_w[layer, k])
        acc = acc + conv_b[layer]                 # (1, C) broadcast
        cur = jnp.maximum(acc, 0.0) + cur
    return cur @ dense_w + dense_b


# ---------------------------------- main -------------------------------------
if __name__ == "__main__":
    key = jax.random.PRNGKey(0)
    kx, kw, kb, kdw, kdb = jax.random.split(key, 5)

    x = jax.random.normal(kx, (B, L, C), dtype=jnp.float32)

    # Conv1d weights: PyTorch shape is (out_ch, in_ch, K); stored here already
    # transposed to (layer, K, in_ch, out_ch) for the matmul formulation.
    conv_w = 0.1 * jax.random.normal(kw, (NUM_LAYERS, K, C, C), dtype=jnp.float32)
    conv_b = 0.1 * jax.random.normal(kb, (NUM_LAYERS, 1, C), dtype=jnp.float32)

    dense_w = 0.1 * jax.random.normal(kdw, (C, C), dtype=jnp.float32)
    dense_b = 0.1 * jax.random.normal(kdb, (1, C), dtype=jnp.float32)

    # Pack parameters ONCE (hoisted out of the per-call path).
    packed = jax.block_until_ready(pack_params(conv_w, conv_b, dense_w, dense_b))

    out = tcn_forward(x, packed)
    jax.block_until_ready(out)

    ref = tcn_reference(x, conv_w, conv_b, dense_w, dense_b)
    if not jnp.allclose(out, ref, atol=1e-5, rtol=1e-5):
        raise AssertionError("Pallas TCN kernel does not match JAX reference")

    print("KERNEL_OK")
</pallas_src>

<mosaic_0001>
module attributes {stable_mosaic.version = 11 : i64} {
  func.func @tcn_kernel(%arg0: memref<8x32xf32, #tpu.memory_space<vmem>>, %arg1: memref<8x59xf32, #tpu.memory_space<vmem>>, %arg2: memref<8x32xf32, #tpu.memory_space<vmem>>) attributes {dimension_semantics = [], scalar_prefetch = 0 : i64, scratch_operands = 0 : i64, tpu.core_type = #tpu.core_type<tc>} {
    %c0 = arith.constant 0 : index
    %c0_0 = arith.constant 0 : index
    %0 = vector.load %arg0[%c0, %c0_0] : memref<8x32xf32, #tpu.memory_space<vmem>>, vector<8x32xf32>
    %1 = tpu.iota {dimensions = array<i32: 1>} : vector<8x32xi32>
    %c16_i32 = arith.constant 16 : i32
    %c0_i32 = arith.constant 0 : i32
    %2 = arith.cmpi eq, %c16_i32, %c0_i32 : i32
    %c1_i32 = arith.constant 1 : i32
    %3 = arith.select %2, %c1_i32, %c16_i32 : i32
    %4 = vector.broadcast %3 : i32 to vector<8x32xi32>
    %5 = arith.remsi %1, %4 : vector<8x32xi32>
    %c0_i32_1 = arith.constant 0 : i32
    %6 = vector.broadcast %c0_i32_1 : i32 to vector<8x32xi32>
    %7 = arith.cmpi ne, %5, %6 : vector<8x32xi32>
    %c0_i32_2 = arith.constant 0 : i32
    %8 = vector.broadcast %c0_i32_2 : i32 to vector<8x32xi32>
    %9 = arith.cmpi slt, %5, %8 : vector<8x32xi32>
    %c0_i32_3 = arith.constant 0 : i32
    %10 = arith.cmpi slt, %3, %c0_i32_3 : i32
    %11 = vector.broadcast %10 : i1 to vector<8x32xi1>
    %12 = vector.broadcast %11 : vector<8x32xi1> to vector<8x32xi1>
    %13 = arith.xori %9, %12 : vector<8x32xi1>
    %14 = arith.andi %13, %7 : vector<8x32xi1>
    %15 = vector.broadcast %3 : i32 to vector<8x32xi32>
    %16 = arith.addi %5, %15 : vector<8x32xi32>
    %17 = arith.select %14, %16, %5 : vector<8x32xi1>, vector<8x32xi32>
    %c0_i32_4 = arith.constant 0 : i32
    %18 = vector.broadcast %c0_i32_4 : i32 to vector<8x32xi32>
    %19 = arith.cmpi sgt, %17, %18 : vector<8x32xi32>
    %c15_i32 = arith.constant 15 : i32
    %20 = vector.broadcast %c15_i32 : i32 to vector<8x32xi32>
    %21 = arith.cmpi slt, %17, %20 : vector<8x32xi32>
    %c1_i32_5 = arith.constant 1 : i32
    %22 = tpu.dynamic_rotate %0 by %c1_i32_5 dim 1 : vector<8x32xf32>, i32 -> vector<8x32xf32>
    %cst = arith.constant 0.000000e+00 : f32
    %23 = vector.broadcast %cst : f32 to vector<8x32xf32>
    %24 = arith.select %19, %22, %23 : vector<8x32xi1>, vector<8x32xf32>
    %c31_i32 = arith.constant 31 : i32
    %25 = tpu.dynamic_rotate %0 by %c31_i32 dim 1 : vector<8x32xf32>, i32 -> vector<8x32xf32>
    %cst_6 = arith.constant 0.000000e+00 : f32
    %26 = vector.broadcast %cst_6 : f32 to vector<8x32xf32>
    %27 = arith.select %21, %25, %26 : vector<8x32xi1>, vector<8x32xf32>
    %28 = tpu.concatenate %24, %0, %27 in 0 : vector<8x32xf32>, vector<8x32xf32>, vector<8x32xf32> -> vector<24x32xf32>
    %c0_7 = arith.constant 0 : index
    %c0_8 = arith.constant 0 : index
    %29 = vector.load %arg1[%c0_7, %c0_8] : memref<8x59xf32, #tpu.memory_space<vmem>>, vector<8x24xf32>
    %c0_9 = arith.constant 0 : index
    %c56 = arith.constant 56 : index
    %30 = vector.load %arg1[%c0_9, %c56] : memref<8x59xf32, #tpu.memory_space<vmem>>, vector<8x1xf32>
    %cst_10 = arith.constant dense<0.000000e+00> : vector<8x32xf32>
    %31 = tpu.matmul %29, %28, %cst_10 {dimension_numbers = #tpu.dot_dimension_numbers<[1], [0], [0], [1], [0, 0, 1, 1], [], []>} : vector<8x24xf32>, vector<24x32xf32>, vector<8x32xf32> -> vector<8x32xf32>
    %32 = vector.broadcast %30 : vector<8x1xf32> to vector<8x32xf32>
    %33 = arith.addf %31, %32 : vector<8x32xf32>
    %cst_11 = arith.constant 0.000000e+00 : f32
    %34 = vector.broadcast %cst_11 : f32 to vector<8x32xf32>
    %35 = arith.maximumf %33, %34 : vector<8x32xf32>
    %36 = arith.addf %35, %0 : vector<8x32xf32>
    %c1_i32_12 = arith.constant 1 : i32
    %37 = tpu.dynamic_rotate %36 by %c1_i32_12 dim 1 : vector<8x32xf32>, i32 -> vector<8x32xf32>
    %cst_13 = arith.constant 0.000000e+00 : f32
    %38 = vector.broadcast %cst_13 : f32 to vector<8x32xf32>
    %39 = arith.select %19, %37, %38 : vector<8x32xi1>, vector<8x32xf32>
    %c31_i32_14 = arith.constant 31 : i32
    %40 = tpu.dynamic_rotate %36 by %c31_i32_14 dim 1 : vector<8x32xf32>, i32 -> vector<8x32xf32>
    %cst_15 = arith.constant 0.000000e+00 : f32
    %41 = vector.broadcast %cst_15 : f32 to vector<8x32xf32>
    %42 = arith.select %21, %40, %41 : vector<8x32xi1>, vector<8x32xf32>
    %43 = tpu.concatenate %39, %36, %42 in 0 : vector<8x32xf32>, vector<8x32xf32>, vector<8x32xf32> -> vector<24x32xf32>
    %c0_16 = arith.constant 0 : index
    %c24 = arith.constant 24 : index
    %44 = vector.load %arg1[%c0_16, %c24] : memref<8x59xf32, #tpu.memory_space<vmem>>, vector<8x24xf32>
    %c0_17 = arith.constant 0 : index
    %c57 = arith.constant 57 : index
    %45 = vector.load %arg1[%c0_17, %c57] : memref<8x59xf32, #tpu.memory_space<vmem>>, vector<8x1xf32>
    %cst_18 = arith.constant dense<0.000000e+00> : vector<8x32xf32>
    %46 = tpu.matmul %44, %43, %cst_18 {dimension_numbers = #tpu.dot_dimension_numbers<[1], [0], [0], [1], [0, 0, 1, 1], [], []>} : vector<8x24xf32>, vector<24x32xf32>, vector<8x32xf32> -> vector<8x32xf32>
    %47 = vector.broadcast %45 : vector<8x1xf32> to vector<8x32xf32>
    %48 = arith.addf %46, %47 : vector<8x32xf32>
    %cst_19 = arith.constant 0.000000e+00 : f32
    %49 = vector.broadcast %cst_19 : f32 to vector<8x32xf32>
    %50 = arith.maximumf %48, %49 : vector<8x32xf32>
    %51 = arith.addf %50, %36 : vector<8x32xf32>
    %c0_20 = arith.constant 0 : index
    %c48 = arith.constant 48 : index
    %52 = vector.load %arg1[%c0_20, %c48] : memref<8x59xf32, #tpu.memory_space<vmem>>, vector<8x8xf32>
    %c0_21 = arith.constant 0 : index
    %c58 = arith.constant 58 : index
    %53 = vector.load %arg1[%c0_21, %c58] : memref<8x59xf32, #tpu.memory_space<vmem>>, vector<8x1xf32>
    %cst_22 = arith.constant dense<0.000000e+00> : vector<8x32xf32>
    %54 = tpu.matmul %52, %51, %cst_22 {dimension_numbers = #tpu.dot_dimension_numbers<[1], [0], [0], [1], [0, 0, 1, 1], [], []>} : vector<8x8xf32>, vector<8x32xf32>, vector<8x32xf32> -> vector<8x32xf32>
    %55 = vector.broadcast %53 : vector<8x1xf32> to vector<8x32xf32>
    %56 = arith.addf %54, %55 : vector<8x32xf32>
    %c0_23 = arith.constant 0 : index
    %c0_24 = arith.constant 0 : index
    %57 = vector.load %arg2[%c0_23, %c0_24] : memref<8x32xf32, #tpu.memory_space<vmem>>, vector<8x32xf32>
    tpu.vector_store %arg2[%c0_23, %c0_24], %56 {strides = array<i32>} : memref<8x32xf32, #tpu.memory_space<vmem>>, vector<8x32xf32>,
    return
  }
}

</mosaic_0001>

<bundles_post_ra>
// kernel: tcn_forward.1
= control target key start
LH: loop header
LB: loop body
LE: loop exit
PB: predicated region body
PF: predicated region fallthrough
CT: control target
= control target key end

     0   :  { %s369_s11 = smov 32   ;;  %vm28_vm0 = vcmask 1047808   ;;  %v370_v3 = vmov 0.0|0.0   ;;  %vm371_vm1 = vmmov 0   ;;  %v372_v4 = vmov 0.0   ;;  %s374_s13 = smov 97   ;;  %s438_s0 = inlined_call_operand.vmem [shape: f32[8,32], index: 0, kind: input, shape index: {}, may-alias: {0,2}]   ;;  %s439_s1 = inlined_call_operand.vmem [shape: f32[8,59], index: 1, kind: input, shape index: {}]   ;;  %s440_s2 = inlined_call_operand.vmem [shape: f32[8,32], index: 2, kind: output, shape index: {}, may-alias: {0,2}]  }
   0x1   :  { %v11_v0 = vld [vmem:[%s438_s0] sm:$0xff]  ;;  %345 = vmatprep.subr.bf16.mxu0 %v370_v3  ;;  %349 = vmatprep.subr.bf16.mxu1 %v370_v3  ;;  %v373_v6 = vmov 56   ;;  %s375_s14 = smov 127   ;;  %v12_v9 = vlaneseq  ;;  %vm376_vm3 = vmmov 1   ;;  %vm50_vm6 = vcmask 195584   ;;  %s379_s15 = smov 80  }
   0x2   :  { %29 = vrot.lane.b32.xlu0 %v11_v0, %s369_s11  ;;  %328 = vmatprep.mubr.msk.f32.mxu0 %vm371_vm1, %v372_v4  ;;  %v44_v5 = vld [vmem:[%s439_s1] sm:$0xff]  ;;  %v377_v25 = vmov 57   ;;  %s378_s1 = smov 104   ;;  %v380_v32 = vmov 58   ;;  %vm226_vm7 = vcmask 64512   ;;  %vm299_vm8 = vcmask 261120  }
   0x3   :  { %337 = vmatprep.mubr.msk.f32.mxu1 %vm371_vm1, %v372_v4  ;;  %365 = vset.pattern.permute.xlu0 %v373_v6  ;;  %v13_v10 = vand.u32 127, %v12_v9 }
   0x4   :  { %366 = vset.pattern.permute.xlu1 %v377_v25 }
   0x5   :  { %v18_v11 = vand.u32 15, %v13_v10 }
   0x7   :  { %vm26_vm2 = vcmp.gt.s32.totalorder %v18_v11, 0  ;;  %vm416_vm5 = vcmp.lt.s32.totalorder %v18_v11, 15 }
   0x8   :  { %vm410_vm4 = vmpackc.low %vm376_vm3, %vm26_vm2 }
  0x74   :  { %v30_v1 = vpop.permute.xlu0 %29 }
  0x75   :  { %v31_v2 = vsel %vm28_vm0, %v30_v1, %v11_v0 }
  0x76   :  { %32 = vrot.lane.b32.xlu0 %v31_v2, %s369_s11 }
  0x7a   :  { %47 = vperm.xlu0 %365, %v44_v5  }
  0x7e   :  { %368 = vset.pattern.permute.xlu0 %v380_v32 }
  0xe8   :  { %v33_v7 = vpop.permute.xlu0 %32 }
  0xe9   :  { %v34_v8 = vsel %vm28_vm0, %v33_v7, %v11_v0 }
  0xea   :  { %36 = vrot.lane.b32.xlu1 %v34_v8, %s374_s13 }
  0xee   :  { %40 = vrot.lane.b32.xlu1 %v34_v8, %s375_s14 }
  0xf9   :  { %v48_v17 = vpop.permute.xlu0 %47 }
 0x15c   :  { %v37_v12 = vpop.permute.xlu1 %36 }
 0x15d   :  { %v346_v14 = vpack.c.bf16 %v11_v0, %v37_v12 }
 0x15f   :  { %348 = vmatpush3.bf16.msk.msra.mxu0 %vm410_vm4, %v346_v14 }
 0x160   :  { %326 = vmatprep.subr.mxu0 %v372_v4  ;;  %v41_v16 = vpop.permute.xlu1 %40 }
 0x163   :  { %327 = vmatpush3.msk.msra.mxu0 %vm416_vm5, %v41_v16 }
 0x164   :  { %329 = vmatmul.mubr.msk.f32.vlgmr.msra.gmra.mrb[0].mxu0 %vm50_vm6, %v44_v5  ;;  %340 = vmatprep.subr.mxu0 %v372_v4 }
 0x165   :  { %342 = vmatprep.mubr.msk.f32.mxu0 %vm371_vm1, %v372_v4 }
 0x237   :  { %v119_v18 = vpop.f32.mrb[0].mxu0 }
 0x238   :  { %v120_v19 = vadd.f32 %v119_v18, %v48_v17  ;;  %v330_v20 = vpop.f32.mrb[1].mxu0 }
 0x23a   :  { %v123_v21 = vmax.f32 %v120_v19, 0.0 }
 0x23c   :  { %v124_v22 = vadd.f32 %v123_v21, %v11_v0 }
 0x23e   :  { %125 = vrot.lane.b32.xlu1 %v124_v22, %s369_s11 }
 0x2b0   :  { %v126_v23 = vpop.permute.xlu1 %125 }
 0x2b1   :  { %v127_v24 = vsel %vm28_vm0, %v126_v23, %v124_v22 }
 0x2b2   :  { %128 = vrot.lane.b32.xlu1 %v127_v24, %s369_s11 }
 0x324   :  { %v129_v26 = vpop.permute.xlu1 %128 }
 0x325   :  { %v130_v27 = vsel %vm28_vm0, %v129_v26, %v124_v22 }
 0x326   :  { %136 = vrot.lane.b32.xlu1 %v130_v27, %s375_s14  ;;  %132 = vrot.lane.b32.xlu0 %v130_v27, %s374_s13 }
 0x32a   :  { %144 = vrot.lane.b32.xlu0 %v44_v5, %s378_s1  ;;  %141 = vperm.xlu1 %366, %v44_v5  }
 0x32e   :  { %224 = vrot.lane.b32.xlu0 %v44_v5, %s379_s15  ;;  %367 = vset.pattern.permute.xlu1 %v380_v32 }
 0x32f   :  { %221 = vperm.xlu1 %367, %v44_v5  }
 0x398   :  { %v133_v28 = vpop.permute.xlu0 %132  ;;  %v137_v31 = vpop.permute.xlu1 %136 }
 0x399   :  { %v350_v29 = vpack.c.bf16 %v124_v22, %v133_v28 }
 0x39b   :  { %352 = vmatpush3.bf16.msk.msra.mxu1 %vm410_vm4, %v350_v29 }
 0x39c   :  { %335 = vmatprep.subr.mxu1 %v372_v4  ;;  %v145_v30 = vpop.permute.xlu0 %144 }
 0x39f   :  { %336 = vmatpush3.msk.msra.mxu1 %vm416_vm5, %v137_v31 }
 0x3a0   :  { %338 = vmatmul.mubr.msk.f32.vlgmr.msra.gmra.mrb[0].mxu1 %vm50_vm6, %v145_v30  ;;  %v225_v39 = vpop.permute.xlu0 %224 }
 0x3a9   :  { %v142_v33 = vpop.permute.xlu1 %141 }
 0x3ae   :  { %v222_v40 = vpop.permute.xlu1 %221 }
 0x473   :  { %v214_v34 = vpop.f32.mrb[0].mxu1 }
 0x474   :  { %v215_v35 = vadd.f32 %v214_v34, %v142_v33  ;;  %v339_v36 = vpop.f32.mrb[1].mxu1 }
 0x476   :  { %v218_v37 = vmax.f32 %v215_v35, 0.0 }
 0x478   :  { %v219_v38 = vadd.f32 %v218_v37, %v124_v22 }
 0x47a   :  { %341 = vmatpush3.msra.mxu0 %v219_v38 }
 0x47b   :  { %343 = vmatmul.mubr.msk.f32.vlgmr.msra.gmra.mrb[2].mxu0 %vm226_vm7, %v225_v39 }
 0x54e   :  { %v295_v41 = vpop.f32.mrb[2].mxu0 }
 0x54f   :  { %v296_v42 = vadd.f32 %v295_v41, %v222_v40  ;;  %v344_v43 = vpop.f32.mrb[3].mxu0 }
 0x551   :  { %300 = vst.msk [vmem:[%s440_s2] sm:$0xff] %vm299_vm8, %v296_v42 }

</bundles_post_ra>
